<compile_context>
chip_gen: v5e
topology: v5e:2x2
jax: 0.10.0
libtpu: 0.0.40
codegen_flags: <defaults>
</compile_context>

<pallas_src>
import math
import numpy as np

import jax
import jax.numpy as jnp
from jax.experimental import pallas as pl
from jax.experimental.pallas import tpu as pltpu


def _round_up(a, m):
    return ((a + m - 1) // m) * m


def _tpu_tuning():
    """Generation-aware (VMEM limit, max row tile). v7x: 64 MiB; v5e/v6e: 128 MiB."""
    vmem_bytes = 64 * 1024 * 1024
    try:
        info = pltpu.get_tpu_info()
        vmem_bytes = int(getattr(info, "vmem_capacity_bytes", vmem_bytes))
    except Exception:
        pass
    if vmem_bytes >= 100 * 1024 * 1024:          # v5e / v6e (128 MiB physical)
        return 96 * 1024 * 1024, 1024
    return 40 * 1024 * 1024, 512                 # v7x (64 MiB physical), conservative


_VMEM_LIMIT, _MAX_ROW_TILE = _tpu_tuning()


def _row_tile(n):
    return min(_MAX_ROW_TILE, _round_up(n, 8))


# ----------------------------------------------------------------------------
# Pallas kernels
# ----------------------------------------------------------------------------
def _linear_kernel(x_ref, w_ref, b_ref, o_ref):
    # In-kernel bf16 cast of the activation tile (free VPU slot); bf16 weights
    # pre-converted once; f32 accumulation on the MXU.
    acc = jnp.dot(x_ref[...].astype(jnp.bfloat16), w_ref[...],
                  preferred_element_type=jnp.float32) + b_ref[...]
    o_ref[...] = acc.astype(o_ref.dtype)


def _bn_relu_linear_kernel(x_ref, ss_ref, w_ref, b_ref, o_ref):
    # Fused BatchNorm(batch stats)+ReLU prologue: relu(x*scale + shift) @ W + b.
    xn = jnp.maximum(x_ref[...] * ss_ref[0:1, :] + ss_ref[1:2, :], 0.0)
    acc = jnp.dot(xn.astype(jnp.bfloat16), w_ref[...],
                  preferred_element_type=jnp.float32) + b_ref[...]
    o_ref[...] = acc.astype(o_ref.dtype)


def pallas_linear(x, w_bf16, b, *, scale_shift=None, out_dtype=jnp.float32):
    """(N, F) @ (F, O) + (O,), optionally with a fused BN+ReLU prologue.

    Row-tiled with cdiv grid (no row padding), "parallel" grid semantics.
    """
    n, f = x.shape
    o = w_bf16.shape[1]
    tn = _row_tile(n)
    grid = (pl.cdiv(n, tn),)
    x_spec = pl.BlockSpec((tn, f), lambda i: (i, 0))
    w_spec = pl.BlockSpec((f, o), lambda i: (0, 0))
    b_spec = pl.BlockSpec((1, o), lambda i: (0, 0))
    out_spec = pl.BlockSpec((tn, o), lambda i: (i, 0))
    cp = pltpu.CompilerParams(dimension_semantics=("parallel",),
                              vmem_limit_bytes=_VMEM_LIMIT)
    b2 = b.reshape(1, o).astype(jnp.float32)
    if scale_shift is None:
        return pl.pallas_call(
            _linear_kernel,
            out_shape=jax.ShapeDtypeStruct((n, o), out_dtype),
            grid_spec=pltpu.PrefetchScalarGridSpec(
                num_scalar_prefetch=0, grid=grid,
                in_specs=[x_spec, w_spec, b_spec], out_specs=out_spec),
            compiler_params=cp,
        )(x.astype(jnp.float32), w_bf16, b2)
    ss_spec = pl.BlockSpec((2, f), lambda i: (0, 0))
    return pl.pallas_call(
        _bn_relu_linear_kernel,
        out_shape=jax.ShapeDtypeStruct((n, o), out_dtype),
        grid_spec=pltpu.PrefetchScalarGridSpec(
            num_scalar_prefetch=0, grid=grid,
            in_specs=[x_spec, ss_spec, w_spec, b_spec], out_specs=out_spec),
        compiler_params=cp,
    )(x.astype(jnp.float32), scale_shift.astype(jnp.float32), w_bf16, b2)


def pallas_bn_scale_shift(x, gamma, beta, eps=1e-5):
    """Row-tiled reduction producing per-feature (scale, shift) = (gamma*rstd,
    beta - mean*gamma*rstd), so the consumer applies BN+ReLU as one FMA+max."""
    n, c = x.shape
    tn = _row_tile(n)
    grid_n = pl.cdiv(n, tn)
    inv_n = 1.0 / float(n)

    def kernel(x_ref, g_ref, b_ref, o_ref, s_ref, sq_ref):
        i = pl.program_id(0)

        @pl.when(i == 0)
        def _():
            s_ref[...] = jnp.zeros_like(s_ref)
            sq_ref[...] = jnp.zeros_like(sq_ref)

        # Mask rows beyond N (last block may be ragged; OOB reads are garbage).
        rows = jax.lax.broadcasted_iota(jnp.int32, (tn, 1), 0) + i * tn
        xm = jnp.where(rows < n, x_ref[...], 0.0)
        s_ref[...] += jnp.sum(xm, axis=0, keepdims=True)
        sq_ref[...] += jnp.sum(xm * xm, axis=0, keepdims=True)

        @pl.when(i == grid_n - 1)
        def _():
            mean = s_ref[...] * inv_n
            var = jnp.maximum(sq_ref[...] * inv_n - mean * mean, 0.0)
            scale = g_ref[...] * jax.lax.rsqrt(var + eps)
            o_ref[0:1, :] = scale
            o_ref[1:2, :] = b_ref[...] - mean * scale

    return pl.pallas_call(
        kernel,
        out_shape=jax.ShapeDtypeStruct((2, c), jnp.float32),
        grid_spec=pltpu.PrefetchScalarGridSpec(
            num_scalar_prefetch=0,
            grid=(grid_n,),
            in_specs=[pl.BlockSpec((tn, c), lambda i: (i, 0)),
                      pl.BlockSpec((1, c), lambda i: (0, 0)),
                      pl.BlockSpec((1, c), lambda i: (0, 0))],
            out_specs=pl.BlockSpec((2, c), lambda i: (0, 0)),
            scratch_shapes=[pltpu.VMEM((1, c), jnp.float32),
                            pltpu.VMEM((1, c), jnp.float32)]),
        compiler_params=pltpu.CompilerParams(
            dimension_semantics=("arbitrary",),     # reduction axis
            vmem_limit_bytes=_VMEM_LIMIT),
    )(x.astype(jnp.float32), gamma.astype(jnp.float32), beta.astype(jnp.float32))


def pallas_gru(gi_dense, w_h_bf16, b_hn, t_actual, tk):
    """GRU recurrence over a (T_pad, B_pad, 3H) bf16 stream of precomputed
    input-gate activations. Time axis chunked by `tk`, hidden state resident
    in VMEM scratch. Sequential axis -> "arbitrary"."""
    t_pad, b_pad, h3 = gi_dense.shape
    hd = h3 // 3

    def kernel(gi_ref, wh_ref, bhn_ref, o_ref, h_ref):
        ci = pl.program_id(0)

        @pl.when(ci == 0)
        def _():
            h_ref[...] = jnp.zeros_like(h_ref)

        def step(s, hcur):
            gi = gi_ref[s].astype(jnp.float32)                       # (B, 3H)
            gh = jnp.dot(hcur.astype(jnp.bfloat16), wh_ref[...],
                         preferred_element_type=jnp.float32)          # (B, 3H)
            r = jax.nn.sigmoid(gi[:, :hd] + gh[:, :hd])
            z = jax.nn.sigmoid(gi[:, hd:2 * hd] + gh[:, hd:2 * hd])
            nv = jnp.tanh(gi[:, 2 * hd:] + r * (gh[:, 2 * hd:] + bhn_ref[...]))
            h_new = (1.0 - z) * nv + z * hcur
            # Steps beyond the true T (chunk padding) must not advance h.
            return jnp.where(ci * tk + s < t_actual, h_new, hcur)

        hout = jax.lax.fori_loop(0, tk, step, h_ref[...], unroll=True)
        h_ref[...] = hout
        o_ref[...] = hout          # constant out block -> final hidden survives

    return pl.pallas_call(
        kernel,
        out_shape=jax.ShapeDtypeStruct((b_pad, hd), jnp.float32),
        grid_spec=pltpu.PrefetchScalarGridSpec(
            num_scalar_prefetch=0,
            grid=(t_pad // tk,),
            in_specs=[pl.BlockSpec((tk, b_pad, h3), lambda ci: (ci, 0, 0)),
                      pl.BlockSpec((hd, h3), lambda ci: (0, 0)),
                      pl.BlockSpec((1, hd), lambda ci: (0, 0))],
            out_specs=pl.BlockSpec((b_pad, hd), lambda ci: (0, 0)),
            scratch_shapes=[pltpu.VMEM((b_pad, hd), jnp.float32)]),
        compiler_params=pltpu.CompilerParams(
            dimension_semantics=("arbitrary",),     # sequential recurrence
            vmem_limit_bytes=_VMEM_LIMIT),
    )(gi_dense, w_h_bf16, b_hn.reshape(1, hd).astype(jnp.float32))


# ----------------------------------------------------------------------------
# Model pieces (data-dependent graph ops in plain JAX, matmuls/BN/GRU in Pallas)
# ----------------------------------------------------------------------------
def _attention(q, k, v, edge_src, edge_dst, n, c):
    """TransformerConv message passing (root weight disabled by DirGNNConv).

    TODO(synk): edge gather + per-destination segment softmax + scatter-sum is
    a data-dependent scatter; kept in plain JAX (segment_max/segment_sum).
    """
    logits = jnp.sum(q[edge_dst] * k[edge_src], axis=-1) / math.sqrt(c)   # (E, H)
    amax = jax.ops.segment_max(logits, edge_dst, num_segments=n)          # (N, H)
    ex = jnp.exp(logits - amax[edge_dst])
    denom = jax.ops.segment_sum(ex, edge_dst, num_segments=n)
    attn = ex / (denom[edge_dst] + 1e-16)                                 # (E, H)
    # dropout on attn: eval mode -> no-op
    msg = v[edge_src] * attn[:, :, None]                                  # (E, H, C)
    out = jax.ops.segment_sum(msg, edge_dst, num_segments=n)              # (N, H, C)
    return jnp.mean(out, axis=1)                                          # concat=False


def gru_aggregate(gi_nodes, index_np, num_segments, gru_p):
    """GRUAggregation: scatter per-node gate activations into a dense
    (T_pad, B_pad, 3H) batch (padding value = fused input bias == gates of a
    zero input, matching torch's zero-padded to_dense_batch), run the GRU,
    take the final hidden state."""
    index_np = np.asarray(index_np)
    n, h3 = gi_nodes.shape
    counts = np.bincount(index_np, minlength=num_segments)
    t = int(counts.max())
    tk = min(16, t)                       # timesteps per grid step
    t_pad = _round_up(t, tk)
    b_pad = _round_up(num_segments, 8)    # sublane-aligned batch
    seg_start = np.concatenate([[0], np.cumsum(counts)[:-1]])
    pos = np.arange(n) - seg_start[index_np]           # index is sorted

    bias = gru_p["b_i_fused"].astype(jnp.bfloat16)
    dense = jnp.broadcast_to(bias, (t_pad, b_pad, h3))
    dense = dense.at[jnp.asarray(pos, jnp.int32),
                     jnp.asarray(index_np, jnp.int32)].set(gi_nodes)

    h_final = pallas_gru(dense, gru_p["w_h_cat"], gru_p["b_hn"], t, tk)
    return h_final[:num_segments]


def prepare_batches_for_subtrees(batch_subtree_index, subtree_index, subtree_labels):
    labels_list = [np.asarray(subtree_labels[i], np.float32) for i in batch_subtree_index]
    index_list = [np.asarray(subtree_index[i], np.int32) for i in batch_subtree_index]
    all_labels = np.concatenate(labels_list)
    all_index = np.concatenate(index_list)
    b = len(batch_subtree_index)

    label_counts = np.array([len(l) for l in labels_list])
    tree_ids = np.repeat(np.arange(b), label_counts)
    global_labels = np.full((b,), -np.inf, np.float32)
    np.maximum.at(global_labels, tree_ids, all_labels)       # scatter_reduce amax
    local_labels = all_labels / global_labels[tree_ids]

    index_counts = np.array([len(idx) for idx in index_list])
    sizes = np.array([int(idx.max()) + 1 for idx in index_list])
    ends = np.cumsum(sizes)
    starts = ends - sizes
    batched_index = all_index + np.repeat(starts, index_counts)
    global_tree_index = (ends - 1).tolist()
    return (batched_index, global_tree_index,
            jnp.asarray(global_labels), jnp.asarray(local_labels))


def bigg_forward(params, node_features, edge_index,
                 batch_subtree_index, subtree_index, subtree_labels,
                 *, heads, emb, alpha, n_layers):
    x = jnp.asarray(node_features, jnp.float32)

    num = sum(len(subtree_index[i]) for i in batch_subtree_index)
    assert num == x.shape[0], f"Number of nodes mismatch! Expected {num}, got {x.shape[0]}"

    batched_index, global_tree_index, global_labels, local_labels = \
        prepare_batches_for_subtrees(batch_subtree_index, subtree_index, subtree_labels)

    src, dst = edge_index[0], edge_index[1]
    n = x.shape[0]
    hc = heads * emb
    scale_shift = None     # previous layer's BN+ReLU, fused into this layer's projection

    for i in range(n_layers):
        p = params["conv"][i]
        # ONE fused matmul: [Q|K|V]_in | [Q|K|V]_out | root(pad->128)  (N, 6*hc+128)
        fused = pallas_linear(x, p["w_all"], p["b_all"], scale_shift=scale_shift)
        q_in = fused[:, 0 * hc:1 * hc].reshape(n, heads, emb)
        k_in = fused[:, 1 * hc:2 * hc].reshape(n, heads, emb)
        v_in = fused[:, 2 * hc:3 * hc].reshape(n, heads, emb)
        q_out = fused[:, 3 * hc:4 * hc].reshape(n, heads, emb)
        k_out = fused[:, 4 * hc:5 * hc].reshape(n, heads, emb)
        v_out = fused[:, 5 * hc:6 * hc].reshape(n, heads, emb)
        root = fused[:, 6 * hc:6 * hc + emb]

        x_in = _attention(q_in, k_in, v_in, src, dst, n, emb)        # edges as-is
        x_out = _attention(q_out, k_out, v_out, dst, src, n, emb)    # flipped edges
        # DirGNN combine + root skip (pure elementwise; fused by XLA).
        x = alpha * x_out + (1.0 - alpha) * x_in + root              # pre-BN output

        scale_shift = pallas_bn_scale_shift(
            x, params["bn"][i]["gamma"], params["bn"][i]["beta"])

    # Last BN+ReLU fused into the GRU input-gate projection (runs on N nodes,
    # not T*B); gates emitted in bf16 to halve the recurrence's HBM stream.
    gru_p = params["gru"]
    gi_nodes = pallas_linear(x, gru_p["w_i_cat"], gru_p["b_i_fused"],
                             scale_shift=scale_shift, out_dtype=jnp.bfloat16)

    num_segments = int(np.asarray(batched_index).max()) + 1
    h = gru_aggregate(gi_nodes, batched_index, num_segments, gru_p)   # (S, emb)

    y = h[jnp.asarray(global_tree_index, jnp.int32)]
    g = np.asarray(global_tree_index)
    starts = np.concatenate([[-1], g[:-1]])
    counts = g - starts
    tree_ids = np.repeat(np.arange(len(g)), counts)
    global_idx = g[tree_ids]
    m = jnp.concatenate([h, h[jnp.asarray(global_idx, jnp.int32)]], axis=1)
    return y, m, global_labels, local_labels


# ----------------------------------------------------------------------------
# Deterministic parameter init (fused layouts + one-time bf16 weight cast)
# ----------------------------------------------------------------------------
def init_params(key, f0, emb, heads, n_layers):
    keys = iter(jax.random.split(key, 256))

    def w(shape, scale=0.1):
        return jax.random.normal(next(keys), shape, dtype=jnp.float32) * scale

    hc = heads * emb
    root_pad = _round_up(emb, 128) - emb

    conv_layers, bn_layers = [], []
    cur = f0
    for _ in range(n_layers):
        w_qkv_in, b_qkv_in = w((cur, 3 * hc)), w((3 * hc,))
        w_qkv_out, b_qkv_out = w((cur, 3 * hc)), w((3 * hc,))
        w_root, b_root = w((cur, emb)), w((emb,))
        w_all = jnp.concatenate(
            [w_qkv_in, w_qkv_out, jnp.pad(w_root, ((0, 0), (0, root_pad)))], axis=1)
        b_all = jnp.concatenate(
            [b_qkv_in, b_qkv_out, jnp.pad(b_root, (0, root_pad))])
        conv_layers.append(dict(w_all=w_all.astype(jnp.bfloat16), b_all=b_all))
        bn_layers.append(dict(gamma=jnp.ones((1, emb), jnp.float32),
                              beta=jnp.zeros((1, emb), jnp.float32)))
        cur = emb

    # GRU params, fused: W_i (F, 3H); b_ir+b_hr / b_iz+b_hz folded into the
    # input-gate bias (b_hn kept separate — it is gated by r); W_h (H, 3H).
    w_ir, w_iz, w_in_ = w((emb, emb)), w((emb, emb)), w((emb, emb))
    b_ir, b_iz, b_in_ = w((emb,)), w((emb,)), w((emb,))
    w_hr, w_hz, w_hn = w((emb, emb)), w((emb, emb)), w((emb, emb))
    b_hr, b_hz, b_hn = w((emb,)), w((emb,)), w((emb,))
    gru = dict(
        w_i_cat=jnp.concatenate([w_ir, w_iz, w_in_], axis=1).astype(jnp.bfloat16),
        b_i_fused=jnp.concatenate([b_ir + b_hr, b_iz + b_hz, b_in_]),
        w_h_cat=jnp.concatenate([w_hr, w_hz, w_hn], axis=1).astype(jnp.bfloat16),
        b_hn=b_hn,
    )
    return dict(conv=conv_layers, bn=bn_layers, gru=gru)


# ----------------------------------------------------------------------------
# Main
# ----------------------------------------------------------------------------
if __name__ == "__main__":
    key = jax.random.PRNGKey(0)
    k_feat, k_edge, k_lab0, k_lab1, k_param = jax.random.split(key, 5)

    node_feature_dim = 8
    embedding_dim = 32
    heads = 4
    n_conv_layers = 2
    dirgnn_alpha = 0.5

    # subtree structure (2 trees): each entry maps the tree's nodes to subtree ids
    subtree_index = [
        np.array([0, 0, 1, 1, 1, 2, 2, 2, 2], dtype=np.int32),  # tree 0: 9 nodes, 3 subtrees
        np.array([0, 0, 0, 1, 1, 1, 1], dtype=np.int32),         # tree 1: 7 nodes, 2 subtrees
    ]
    subtree_labels = [
        np.asarray(jax.random.uniform(k_lab0, (3,), jnp.float32) + 0.5),
        np.asarray(jax.random.uniform(k_lab1, (2,), jnp.float32) + 0.5),
    ]
    batch_subtree_index = [0, 1]

    num_nodes = 16
    node_features = jax.random.normal(k_feat, (num_nodes, node_feature_dim), jnp.float32)
    edge_index = jax.random.randint(k_edge, (2, 24), 0, num_nodes, dtype=jnp.int32)

    params = init_params(k_param, node_feature_dim, embedding_dim, heads, n_conv_layers)

    y, M, batch_global_labels, batch_local_labels = bigg_forward(
        params, node_features, edge_index,
        batch_subtree_index, subtree_index, subtree_labels,
        heads=heads, emb=embedding_dim, alpha=dirgnn_alpha, n_layers=n_conv_layers)

    jax.block_until_ready((y, M, batch_global_labels, batch_local_labels))

    assert y.shape == (2, embedding_dim)
    assert M.shape == (5, 2 * embedding_dim)
    assert batch_global_labels.shape == (2,)
    assert batch_local_labels.shape == (5,)
    assert bool(jnp.all(jnp.isfinite(y))) and bool(jnp.all(jnp.isfinite(M)))
    print("KERNEL_OK")
</pallas_src>

<mosaic_0001>
module attributes {stable_mosaic.version = 11 : i64} {
  func.func @_linear_kernel(%arg0: i32, %arg1: memref<16x8xf32, #tpu.memory_space<vmem>>, %arg2: memref<8x896xbf16, #tpu.memory_space<vmem>>, %arg3: memref<1x896xf32, #tpu.memory_space<vmem>>, %arg4: memref<16x896xf32, #tpu.memory_space<vmem>>) attributes {dimension_semantics = [#tpu.dimension_semantics<parallel>], iteration_bounds = array<i64: 1>, scalar_prefetch = 0 : i64, scratch_operands = 0 : i64, tpu.core_type = #tpu.core_type<tc>, window_params = [{transform_indices = @transform_0, window_bounds = array<i64: 16, 8>}, {pipeline_mode = #tpu.pipeline_mode<synchronous>, transform_indices = @transform_1, window_bounds = array<i64: 8, 896>}, {pipeline_mode = #tpu.pipeline_mode<synchronous>, transform_indices = @transform_2, window_bounds = array<i64: 1, 896>}, {transform_indices = @transform_3, window_bounds = array<i64: 16, 896>}]} {
    %c0 = arith.constant 0 : index
    %c0_0 = arith.constant 0 : index
    %0 = vector.load %arg1[%c0, %c0_0] : memref<16x8xf32, #tpu.memory_space<vmem>>, vector<16x8xf32>
    %1 = arith.truncf %0 : vector<16x8xf32> to vector<16x8xbf16>
    %c0_1 = arith.constant 0 : index
    %c0_2 = arith.constant 0 : index
    %2 = vector.load %arg2[%c0_1, %c0_2] : memref<8x896xbf16, #tpu.memory_space<vmem>>, vector<8x896xbf16>
    %cst = arith.constant dense<0.000000e+00> : vector<16x896xf32>
    %3 = tpu.matmul %1, %2, %cst {dimension_numbers = #tpu.dot_dimension_numbers<[1], [0], [0], [1], [0, 0, 1, 1], [], []>} : vector<16x8xbf16>, vector<8x896xbf16>, vector<16x896xf32> -> vector<16x896xf32>
    %c0_3 = arith.constant 0 : index
    %c0_4 = arith.constant 0 : index
    %4 = vector.load %arg3[%c0_3, %c0_4] : memref<1x896xf32, #tpu.memory_space<vmem>>, vector<1x896xf32>
    %5 = vector.broadcast %4 : vector<1x896xf32> to vector<16x896xf32>
    %6 = arith.addf %3, %5 : vector<16x896xf32>
    %c0_5 = arith.constant 0 : index
    %c0_6 = arith.constant 0 : index
    %7 = vector.load %arg4[%c0_5, %c0_6] : memref<16x896xf32, #tpu.memory_space<vmem>>, vector<16x896xf32>
    tpu.vector_store %arg4[%c0_5, %c0_6], %6 {strides = array<i32>} : memref<16x896xf32, #tpu.memory_space<vmem>>, vector<16x896xf32>,
    return
  }
  func.func @transform_0(%arg0: i32) -> (i32, i32) {
    %c0_i32 = arith.constant 0 : i32
    %c0_i32_0 = arith.constant 0 : i32
    return %arg0, %c0_i32 : i32, i32
  }
  func.func @transform_1(%arg0: i32) -> (i32, i32) {
    %c0_i32 = arith.constant 0 : i32
    %c0_i32_0 = arith.constant 0 : i32
    %c0_i32_1 = arith.constant 0 : i32
    return %c0_i32, %c0_i32_0 : i32, i32
  }
  func.func @transform_2(%arg0: i32) -> (i32, i32) {
    %c0_i32 = arith.constant 0 : i32
    %c0_i32_0 = arith.constant 0 : i32
    %c0_i32_1 = arith.constant 0 : i32
    return %c0_i32, %c0_i32_0 : i32, i32
  }
  func.func @transform_3(%arg0: i32) -> (i32, i32) {
    %c0_i32 = arith.constant 0 : i32
    %c0_i32_0 = arith.constant 0 : i32
    return %arg0, %c0_i32 : i32, i32
  }
}

</mosaic_0001>

<bundles_post_ra>
// kernel: tpu_custom_call.1
= control target key start
LH: loop header
LB: loop body
LE: loop exit
PB: predicated region body
PF: predicated region fallthrough
CT: control target
= control target key end

     0   :  { %8 = vsyncpa [#allocation3], 0  ;;  %s337_s0 = inlined_call_operand.vmem [shape: f32[16,8], index: 0, kind: input, shape index: {}]   ;;  %s338_s1 = inlined_call_operand.hbm [shape: bf16[8,896], index: 1, kind: input, shape index: {}]   ;;  %s339_s2 = inlined_call_operand.vmem [shape: f32[1,896], index: 2, kind: input, shape index: {}]   ;;  %s340_s3 = inlined_call_operand.hbm [shape: f32[16,896], index: 3, kind: output, shape index: {}]  }
   0x1   :  { %9 = vsyncpa [#allocation4], 0  ;;  %s17_s14 = sshll.u32 %s338_s1, 4  ;;  %s291_s15 = smov [#allocation2]   ;;  %s18_s14 = int_to_ptr.hbm [resolvable:$true] %s17_s14 }
   0x2   :  { %s19_s16 = sshll.u32 %s291_s15, 4  ;;  %s20_s16 = int_to_ptr.vmem [resolvable:$true] %s19_s16 }
   0x3   :  { %22 = dma.hbm_to_vmem [thread:$0]  %s18_s14, 448, %s20_s16, [#allocation3]  }
   0x4   :  { %287 = dma.done.wait [#allocation3], 448  }
   0x5   :  { %288 = vsyncadd [#allocation3], 4294966848  ;;  %v33_v0 = vld [vmem:[#allocation2] sm:$0xff]  ;;  %v34_v1 = vld [vmem:[#allocation2 + $0x8] sm:$0xff]  ;;  %vm75_vm0 = vcmask 1043456   ;;  %vm71_vm1 = vcmask 64512  }
   0x6   :  { %v30_v2 = vld [vmem:[%s337_s0] sm:$0xff]  ;;  %v57_v3 = vunpack.c.l.b16 %v33_v0  ;;  %v58_v4 = vunpack.c.h.b16 %v33_v0  ;;  %v59_v5 = vunpack.c.l.b16 %v34_v1  ;;  %v31_v6 = vld [vmem:[%s337_s0 + $0x8] sm:$0xff]  ;;  %v36_v7 = vld [vmem:[#allocation2 + $0x18] sm:$0xf]  ;;  %v60_v8 = vunpack.c.h.b16 %v34_v1  ;;  %s215_s24 = sshll.u32 %s340_s3, 4  ;;  %s293_s25 = smov 896   ;;  %s216_s24 = int_to_ptr.hbm [resolvable:$true] %s215_s24 }
   0x7   :  { %v35_v9 = vld [vmem:[#allocation2 + $0x10] sm:$0xff]  ;;  %v63_v10 = vunpack.c.l.b16 %v36_v7  ;;  %v32_v17 = vpack.c.bf16 %v31_v6, %v30_v2  ;;  %v37_v28 = vld [vmem:[%s339_s2] sm:$0xff]  ;;  %s292_s2 = smov [#allocation5]   ;;  %s294_s26 = smov 56  }
   0x8   :  { %v61_v11 = vunpack.c.l.b16 %v35_v9  ;;  %v62_v12 = vunpack.c.h.b16 %v35_v9  ;;  %v64_v13 = vpack.c.b16 %v57_v3, %v57_v3  ;;  %v65_v14 = vpack.c.b16 %v58_v4, %v58_v4  ;;  %s213_s21 = sshll.u32 %s292_s2, 4  ;;  %s214_s21 = int_to_ptr.vmem [resolvable:$true] %s213_s21 }
   0x9   :  { %v66_v15 = vpack.c.b16 %v59_v5, %v59_v5  ;;  %v67_v16 = vpack.c.b16 %v60_v8, %v60_v8  ;;  %v70_v18 = vpack.c.b16 %v63_v10, %v63_v10  ;;  %v39_v29 = vperm.slane %v37_v28, 0 }
   0xa   :  { %v68_v19 = vpack.c.b16 %v61_v11, %v61_v11  ;;  %v69_v20 = vpack.c.b16 %v62_v12, %v62_v12  ;;  %v77_v21 = vsel %vm75_vm0, %v64_v13, 0  ;;  %v80_v22 = vsel %vm75_vm0, %v65_v14, 0 }
   0xb   :  { %v83_v23 = vsel %vm75_vm0, %v66_v15, 0  ;;  %v86_v24 = vsel %vm75_vm0, %v67_v16, 0  ;;  %104 = vmatpush.bf16.msra.mxu0 %v77_v21  ;;  %118 = vmatpush.bf16.msra.mxu1 %v80_v22  ;;  %v95_v25 = vsel %vm75_vm0, %v70_v18, 0  ;;  %v40_v30 = vperm.slane %v37_v28, 1 }
   0xc   :  { %v89_v26 = vsel %vm75_vm0, %v68_v19, 0  ;;  %132 = vmatpush.bf16.msra.mxu2 %v83_v23  ;;  %146 = vmatpush.bf16.msra.mxu3 %v86_v24  ;;  %v92_v27 = vsel %vm75_vm0, %v69_v20, 0  ;;  %v41_v35 = vperm.slane %v37_v28, 2  ;;  %v42_v36 = vperm.slane %v37_v28, 3 }
   0xd   :  { %v43_v45 = vperm.slane %v37_v28, 4  ;;  %v44_v46 = vperm.slane %v37_v28, 5  ;;  %v45_v55 = vperm.slane %v37_v28, 6 }
   0xe   :  { %228 = vmatmul.msk.bf16.vlgmr.msra.gmra.mxu0 %vm71_vm1, %v32_v17  ;;  %229 = vmatmul.msk.bf16.vlgmr.msra.gmra.mxu1 %vm71_vm1, %v32_v17 }
   0xf   :  { %160 = vmatpush.bf16.msrb.mxu0 %v89_v26  ;;  %230 = vmatmul.msk.bf16.vlgmr.msra.gmra.mxu2 %vm71_vm1, %v32_v17 }
  0x10   :  { %188 = vmatpush.bf16.msrb.mxu2 %v95_v25  ;;  %174 = vmatpush.bf16.msrb.mxu1 %v92_v27 }
  0x11   :  { %231 = vmatmul.msk.bf16.vlgmr.msra.gmra.mxu3 %vm71_vm1, %v32_v17 }
  0x1e   :  { %232 = vmatmul.msk.bf16.vlgmr.msrb.gmra.mxu0 %vm71_vm1, %v32_v17  ;;  %233 = vmatmul.msk.bf16.vlgmr.msrb.gmra.mxu1 %vm71_vm1, %v32_v17 }
  0x1f   :  { %234 = vmatmul.msk.bf16.vlgmr.msrb.gmra.mxu2 %vm71_vm1, %v32_v17 }
  0x8b   :  { %v106_v31 = vpop.f32.mrf.mxu0  ;;  %v120_v32 = vpop.f32.mrf.mxu1 }
  0x8c   :  { %v107_v33 = vadd.f32 %v106_v31, %v39_v29  ;;  %v121_v34 = vadd.f32 %v120_v32, %v40_v30 }
  0x8e   :  { %195 = vst [vmem:[#allocation5] sm:$0xff] %v107_v33 }
  0x8f   :  { %196 = vst [vmem:[#allocation5 + $0x8] sm:$0xff] %v121_v34 }
  0x92   :  { %v134_v37 = vpop.f32.mrf.mxu2 }
  0x93   :  { %v135_v38 = vadd.f32 %v134_v37, %v41_v35  ;;  %v108_v39 = vpop.f32.mrf.mxu0  ;;  %v122_v40 = vpop.f32.mrf.mxu1 }
  0x94   :  { %v109_v41 = vadd.f32 %v108_v39, %v39_v29  ;;  %v123_v42 = vadd.f32 %v122_v40, %v40_v30  ;;  %v148_v43 = vpop.f32.mrf.mxu3 }
  0x95   :  { %197 = vst [vmem:[#allocation5 + $0x10] sm:$0xff] %v135_v38  ;;  %v149_v44 = vadd.f32 %v148_v43, %v42_v36 }
  0x96   :  { %202 = vst [vmem:[#allocation5 + $0x38] sm:$0xff] %v109_v41 }
  0x97   :  { %203 = vst [vmem:[#allocation5 + $0x40] sm:$0xff] %v123_v42 }
  0x98   :  { %198 = vst [vmem:[#allocation5 + $0x18] sm:$0xff] %v149_v44 }
  0x9a   :  { %v136_v47 = vpop.f32.mrf.mxu2 }
  0x9b   :  { %v137_v48 = vadd.f32 %v136_v47, %v41_v35  ;;  %v162_v49 = vpop.f32.mrf.mxu0  ;;  %v176_v50 = vpop.f32.mrf.mxu1 }
  0x9c   :  { %v163_v51 = vadd.f32 %v162_v49, %v43_v45  ;;  %v177_v52 = vadd.f32 %v176_v50, %v44_v46  ;;  %v150_v53 = vpop.f32.mrf.mxu3 }
  0x9d   :  { %204 = vst [vmem:[#allocation5 + $0x48] sm:$0xff] %v137_v48  ;;  %v151_v54 = vadd.f32 %v150_v53, %v42_v36 }
  0x9e   :  { %199 = vst [vmem:[#allocation5 + $0x20] sm:$0xff] %v163_v51 }
  0x9f   :  { %200 = vst [vmem:[#allocation5 + $0x28] sm:$0xff] %v177_v52 }
  0xa0   :  { %205 = vst [vmem:[#allocation5 + $0x50] sm:$0xff] %v151_v54 }
  0xa2   :  { %v190_v56 = vpop.f32.mrf.mxu2 }
  0xa3   :  { %v191_v57 = vadd.f32 %v190_v56, %v45_v55  ;;  %v164_v58 = vpop.f32.mrf.mxu0  ;;  %v178_v59 = vpop.f32.mrf.mxu1 }
  0xa4   :  { %v165_v60 = vadd.f32 %v164_v58, %v43_v45  ;;  %v179_v61 = vadd.f32 %v178_v59, %v44_v46 }
  0xa5   :  { %201 = vst [vmem:[#allocation5 + $0x30] sm:$0xff] %v191_v57 }
  0xa6   :  { %206 = vst [vmem:[#allocation5 + $0x58] sm:$0xff] %v165_v60 }
  0xa7   :  { %207 = vst [vmem:[#allocation5 + $0x60] sm:$0xff] %v179_v61 }
  0xaa   :  { %v192_v62 = vpop.f32.mrf.mxu2 }
  0xab   :  { %v193_v63 = vadd.f32 %v192_v62, %v45_v55 }
  0xad   :  { %208 = vst [vmem:[#allocation5 + $0x68] sm:$0xff] %v193_v63 }
  0xae   :  { %221 = dma.vmem_to_hbm [thread:$0]  %s214_s21, 1792, %s216_s24, [#allocation4], %s293_s25, %s293_s25, %s294_s26  }
  0xaf   :  { %289 = dma.done.wait [#allocation4], 1792  }
  0xb0   :  { %290 = vsyncadd [#allocation4], 4294965504 }
  0xb1   :  { %226 = vsyncpa [#allocation3], 1 }
  0xb2   :  { %227 = vsyncpa [#allocation4], 1 }

</bundles_post_ra>
